<compile_context>
chip_gen: v7x
topology: tpu7x:2x2x1
jax: 0.10.0
libtpu: 0.0.40
codegen_flags: <defaults>
</compile_context>

<pallas_src>
import jax
import jax.numpy as jnp
from jax.experimental import pallas as pl
from jax.experimental.pallas import tpu as pltpu

EPSILON = 0.05
SINKHORN_ITERS = 3
STUDENT_TEMP = 0.1


def lca_loss_kernel(lens_ref, v_ref, t_ref, w_ref, out_ref):
    bt, v_len, D = v_ref.shape
    max_len = t_ref.shape[1]
    K = w_ref.shape[0]
    B = bt * v_len

    # --- F.normalize(prototype_weight, dim=1, p=2) via rsqrt (EUP slot) ---
    w = w_ref[...]
    sumsq = jnp.sum(w * w, axis=1, keepdims=True)
    w_norm = w * jax.lax.rsqrt(jnp.maximum(sumsq, jnp.float32(1e-24)))

    v = v_ref[...]
    t = t_ref[...]

    # --- fused prototype projection: one MXU matmul for v and t together ---
    # Pre-scaling on the D side deletes the post-matmul /EPSILON and
    # /STUDENT_TEMP passes over [., K]; contracting on the last dim of both
    # operands avoids materializing w_norm.T.
    v2s = v.reshape(B, D) * jnp.float32(1.0 / EPSILON)
    t2s = t.reshape(bt * max_len, D) * jnp.float32(1.0 / STUDENT_TEMP)
    lhs = jnp.concatenate([v2s, t2s], axis=0)                  # [B + bt*max_len, D]
    proj = jax.lax.dot_general(
        lhs, w_norm, (((1,), (1,)), ((), ())),
        preferred_element_type=jnp.float32)                    # [., K]
    v_logits = proj[:B, :]                                     # == v_proj / EPSILON
    t_proj = proj[B:, :].reshape(bt, max_len, K)               # == t_proj / STUDENT_TEMP

    # --- distributed_sinkhorn on P = Q.T  ([B, K]; no transposes needed) ---
    # Row-sums of torch's Q == column-sums of P and vice versa.
    P = jnp.exp(v_logits - jnp.max(v_logits))   # max-shift cancels after P/=sum(P)
    P = P / jnp.sum(P)
    for _ in range(SINKHORN_ITERS):
        colsum = jnp.sum(P, axis=0, keepdims=True)             # [1, K] (Q row sums)
        P = P * pl.reciprocal(colsum * jnp.float32(K), approx=True)
        rowsum = jnp.sum(P, axis=1, keepdims=True)             # [B, 1] (Q col sums)
        P = P * pl.reciprocal(rowsum * jnp.float32(B), approx=True)
    v_probs = (P * jnp.float32(B)).reshape(bt, v_len, K)       # == Q.t()

    # --- batched region similarity + first-argmax one-hot (torch argmax) ---
    sim = jnp.einsum('bld,bvd->blv', t, v,
                     preferred_element_type=jnp.float32)       # [bt, max_len, v_len]
    row_max = jnp.max(sim, axis=-1, keepdims=True)
    col_idx = jax.lax.broadcasted_iota(jnp.int32, (bt, max_len, v_len), 2)
    first_idx = jnp.min(jnp.where(sim == row_max, col_idx, jnp.int32(v_len)),
                        axis=-1, keepdims=True)
    onehot = (col_idx == first_idx).astype(jnp.float32)        # [bt, max_len, v_len]

    # gather of v_probs rows expressed as a batched one-hot matmul (MXU)
    v_indexed = jnp.einsum('blv,bvk->blk', onehot, v_probs,
                           preferred_element_type=jnp.float32)  # [bt, max_len, K]

    # --- batched log_softmax over prototypes + masked per-sentence mean ---
    m = jnp.max(t_proj, axis=-1, keepdims=True)
    logsm = t_proj - m - jnp.log(jnp.sum(jnp.exp(t_proj - m), axis=-1, keepdims=True))
    row_loss = jnp.sum(-v_indexed * logsm, axis=-1)            # [bt, max_len]

    lens = lens_ref[...]                                       # [bt, 1] int32
    row_pos = jax.lax.broadcasted_iota(jnp.int32, (bt, max_len), 1)
    mask = (row_pos < lens).astype(jnp.float32)                # [bt, max_len]
    loss_b = jnp.sum(row_loss * mask, axis=1, keepdims=True) / lens.astype(jnp.float32)
    out_ref[0, 0] = jnp.sum(loss_b) / jnp.float32(bt)


def lca_loss(v_feats, t_feats, t_lengths, weight):
    bt = v_feats.shape[0]
    lens = t_lengths.reshape(bt, 1).astype(jnp.int32)
    out = pl.pallas_call(
        lca_loss_kernel,
        out_shape=jax.ShapeDtypeStruct((1, 1), jnp.float32),
        in_specs=[
            pl.BlockSpec(memory_space=pltpu.MemorySpace.VMEM),   # t_lengths [bt,1]
            pl.BlockSpec(memory_space=pltpu.MemorySpace.VMEM),   # v_feats
            pl.BlockSpec(memory_space=pltpu.MemorySpace.VMEM),   # t_feats
            pl.BlockSpec(memory_space=pltpu.MemorySpace.VMEM),   # prototype weight
        ],
        out_specs=pl.BlockSpec(memory_space=pltpu.MemorySpace.SMEM),
        # ~150 KB resident today; explicit limit leaves headroom on v7x's
        # smaller (64 MiB) VMEM while staying valid on v5e/v6e.
        compiler_params=pltpu.CompilerParams(vmem_limit_bytes=32 * 1024 * 1024),
    )(lens, v_feats, t_feats, weight)
    return out[0, 0]


# ----- pure-JAX reference mirroring the torch module (sanity check) -----
def lca_loss_ref(v_feats, t_feats, t_lengths, weight):
    bt, v_len, D = v_feats.shape
    max_len = t_feats.shape[1]
    K = weight.shape[0]
    w_norm = weight / jnp.maximum(jnp.linalg.norm(weight, axis=1, keepdims=True), 1e-12)

    v_proj = v_feats.reshape(bt * v_len, D) @ w_norm.T
    t_proj = (t_feats.reshape(bt * max_len, D) @ w_norm.T) / STUDENT_TEMP

    Q = jnp.exp(v_proj / EPSILON).T
    B = Q.shape[1]
    Q = Q / jnp.sum(Q)
    for _ in range(SINKHORN_ITERS):
        Q = Q / jnp.sum(Q, axis=1, keepdims=True)
        Q = Q / K
        Q = Q / jnp.sum(Q, axis=0, keepdims=True)
        Q = Q / B
    v_probs = (Q * B).T.reshape(bt, v_len, K)
    t_proj = t_proj.reshape(bt, max_len, K)

    total = 0.0
    for i in range(bt):
        n_word = int(t_lengths[i])
        sim = t_feats[i, :n_word] @ v_feats[i].T
        idx = jnp.argmax(sim, axis=1)
        v_indexed = v_probs[i][idx]
        logsm = jax.nn.log_softmax(t_proj[i, :n_word], axis=-1)
        total = total + jnp.mean(jnp.sum(-v_indexed * logsm, axis=-1))
    return total / bt


if __name__ == "__main__":
    bt, v_len, max_len, in_dim, n_proto = 2, 8, 8, 128, 256

    key = jax.random.PRNGKey(0)
    k1, k2, k3 = jax.random.split(key, 3)
    v_feats = jax.random.normal(k1, (bt, v_len, in_dim), jnp.float32)
    t_feats = jax.random.normal(k2, (bt, max_len, in_dim), jnp.float32)
    # L2-normalize features (typical inputs to this loss; keeps exp(x/eps) finite)
    v_feats = v_feats / jnp.linalg.norm(v_feats, axis=-1, keepdims=True)
    t_feats = t_feats / jnp.linalg.norm(t_feats, axis=-1, keepdims=True)
    t_lengths = jnp.array([5, 8], jnp.int32)
    # deterministic synthetic prototype weight (nn.Linear(in_dim, n_proto).weight shape)
    weight = 0.02 * jax.random.normal(k3, (n_proto, in_dim), jnp.float32)

    loss = jax.block_until_ready(lca_loss(v_feats, t_feats, t_lengths, weight))
    ref = jax.block_until_ready(lca_loss_ref(v_feats, t_feats, t_lengths, weight))

    assert jnp.isfinite(loss), loss
    assert jnp.allclose(loss, ref, rtol=2e-2, atol=2e-2), (loss, ref)
    print("KERNEL_OK")
</pallas_src>

<mosaic_0001>
module attributes {stable_mosaic.version = 11 : i64} {
  func.func @lca_loss_kernel(%arg0: memref<2x1xi32, #tpu.memory_space<vmem>>, %arg1: memref<2x8x128xf32, #tpu.memory_space<vmem>>, %arg2: memref<2x8x128xf32, #tpu.memory_space<vmem>>, %arg3: memref<256x128xf32, #tpu.memory_space<vmem>>, %arg4: memref<1x1xf32, #tpu.memory_space<smem>>) attributes {dimension_semantics = [], scalar_prefetch = 0 : i64, scratch_operands = 0 : i64, tpu.core_type = #tpu.core_type<tc>} {
    %c0 = arith.constant 0 : index
    %c0_0 = arith.constant 0 : index
    %0 = vector.load %arg3[%c0, %c0_0] : memref<256x128xf32, #tpu.memory_space<vmem>>, vector<256x128xf32>
    %1 = arith.mulf %0, %0 : vector<256x128xf32>
    %cst = arith.constant dense<0.000000e+00> : vector<256xf32>
    %2 = vector.multi_reduction <add>, %1, %cst [1] : vector<256x128xf32> to vector<256xf32>
    %3 = vector.shape_cast %2 : vector<256xf32> to vector<256x1xf32>
    %cst_1 = arith.constant 1.000000e-24 : f32
    %4 = vector.broadcast %cst_1 : f32 to vector<256x1xf32>
    %5 = arith.maximumf %3, %4 : vector<256x1xf32>
    %6 = math.rsqrt %5 : vector<256x1xf32>
    %7 = vector.broadcast %6 : vector<256x1xf32> to vector<256x128xf32>
    %8 = arith.mulf %0, %7 : vector<256x128xf32>
    %c0_2 = arith.constant 0 : index
    %c0_3 = arith.constant 0 : index
    %c0_4 = arith.constant 0 : index
    %9 = vector.load %arg1[%c0_2, %c0_3, %c0_4] : memref<2x8x128xf32, #tpu.memory_space<vmem>>, vector<2x8x128xf32>
    %c0_5 = arith.constant 0 : index
    %c0_6 = arith.constant 0 : index
    %c0_7 = arith.constant 0 : index
    %10 = vector.load %arg2[%c0_5, %c0_6, %c0_7] : memref<2x8x128xf32, #tpu.memory_space<vmem>>, vector<2x8x128xf32>
    %11 = vector.shape_cast %9 : vector<2x8x128xf32> to vector<16x128xf32>
    %cst_8 = arith.constant 2.000000e+01 : f32
    %12 = vector.broadcast %cst_8 : f32 to vector<16x128xf32>
    %13 = arith.mulf %11, %12 : vector<16x128xf32>
    %14 = vector.shape_cast %10 : vector<2x8x128xf32> to vector<16x128xf32>
    %cst_9 = arith.constant 1.000000e+01 : f32
    %15 = vector.broadcast %cst_9 : f32 to vector<16x128xf32>
    %16 = arith.mulf %14, %15 : vector<16x128xf32>
    %17 = tpu.concatenate %13, %16 in 0 : vector<16x128xf32>, vector<16x128xf32> -> vector<32x128xf32>
    %cst_10 = arith.constant dense<0.000000e+00> : vector<32x256xf32>
    %18 = tpu.matmul %17, %8, %cst_10 {dimension_numbers = #tpu.dot_dimension_numbers<[1], [1], [0], [0], [0, 0, 1, 0], [], []>} : vector<32x128xf32>, vector<256x128xf32>, vector<32x256xf32> -> vector<32x256xf32>
    %19 = vector.extract_strided_slice %18 {offsets = [0, 0], sizes = [16, 256], strides = [1, 1]} : vector<32x256xf32> to vector<16x256xf32>
    %20 = vector.extract_strided_slice %18 {offsets = [16, 0], sizes = [16, 256], strides = [1, 1]} : vector<32x256xf32> to vector<16x256xf32>
    %21 = vector.shape_cast %20 : vector<16x256xf32> to vector<2x8x256xf32>
    %22 = vector.shape_cast %19 : vector<16x256xf32> to vector<1x16x256xf32>
    %cst_11 = arith.constant dense<0xFF800000> : vector<1xf32>
    %23 = vector.multi_reduction <maximumf>, %22, %cst_11 [1, 2] : vector<1x16x256xf32> to vector<1xf32>
    %24 = vector.shape_cast %23 : vector<1xf32> to vector<1x1x1xf32>
    %25 = vector.extract %24[0, 0, 0] : f32 from vector<1x1x1xf32>
    %26 = vector.broadcast %25 : f32 to vector<16x256xf32>
    %27 = arith.subf %19, %26 : vector<16x256xf32>
    %28 = math.exp %27 : vector<16x256xf32>
    %29 = vector.shape_cast %28 : vector<16x256xf32> to vector<1x16x256xf32>
    %cst_12 = arith.constant dense<0.000000e+00> : vector<1xf32>
    %30 = vector.multi_reduction <add>, %29, %cst_12 [1, 2] : vector<1x16x256xf32> to vector<1xf32>
    %31 = vector.shape_cast %30 : vector<1xf32> to vector<1x1x1xf32>
    %32 = vector.extract %31[0, 0, 0] : f32 from vector<1x1x1xf32>
    %33 = vector.broadcast %32 : f32 to vector<16x256xf32>
    %34 = arith.divf %28, %33 : vector<16x256xf32>
    %cst_13 = arith.constant dense<0.000000e+00> : vector<256xf32>
    %35 = vector.multi_reduction <add>, %34, %cst_13 [0] : vector<16x256xf32> to vector<256xf32>
    %36 = vector.shape_cast %35 : vector<256xf32> to vector<1x256xf32>
    %cst_14 = arith.constant 2.560000e+02 : f32
    %37 = vector.broadcast %cst_14 : f32 to vector<1x256xf32>
    %38 = arith.mulf %36, %37 : vector<1x256xf32>
    %39 = tpu.reciprocal %38 {approx = true} : vector<1x256xf32> -> vector<1x256xf32>
    %40 = vector.broadcast %39 : vector<1x256xf32> to vector<16x256xf32>
    %41 = arith.mulf %34, %40 : vector<16x256xf32>
    %cst_15 = arith.constant dense<0.000000e+00> : vector<16xf32>
    %42 = vector.multi_reduction <add>, %41, %cst_15 [1] : vector<16x256xf32> to vector<16xf32>
    %43 = vector.shape_cast %42 : vector<16xf32> to vector<16x1xf32>
    %cst_16 = arith.constant 1.600000e+01 : f32
    %44 = vector.broadcast %cst_16 : f32 to vector<16x1xf32>
    %45 = arith.mulf %43, %44 : vector<16x1xf32>
    %46 = tpu.reciprocal %45 {approx = true} : vector<16x1xf32> -> vector<16x1xf32>
    %47 = vector.broadcast %46 : vector<16x1xf32> to vector<16x256xf32>
    %48 = arith.mulf %41, %47 : vector<16x256xf32>
    %cst_17 = arith.constant dense<0.000000e+00> : vector<256xf32>
    %49 = vector.multi_reduction <add>, %48, %cst_17 [0] : vector<16x256xf32> to vector<256xf32>
    %50 = vector.shape_cast %49 : vector<256xf32> to vector<1x256xf32>
    %cst_18 = arith.constant 2.560000e+02 : f32
    %51 = vector.broadcast %cst_18 : f32 to vector<1x256xf32>
    %52 = arith.mulf %50, %51 : vector<1x256xf32>
    %53 = tpu.reciprocal %52 {approx = true} : vector<1x256xf32> -> vector<1x256xf32>
    %54 = vector.broadcast %53 : vector<1x256xf32> to vector<16x256xf32>
    %55 = arith.mulf %48, %54 : vector<16x256xf32>
    %cst_19 = arith.constant dense<0.000000e+00> : vector<16xf32>
    %56 = vector.multi_reduction <add>, %55, %cst_19 [1] : vector<16x256xf32> to vector<16xf32>
    %57 = vector.shape_cast %56 : vector<16xf32> to vector<16x1xf32>
    %cst_20 = arith.constant 1.600000e+01 : f32
    %58 = vector.broadcast %cst_20 : f32 to vector<16x1xf32>
    %59 = arith.mulf %57, %58 : vector<16x1xf32>
    %60 = tpu.reciprocal %59 {approx = true} : vector<16x1xf32> -> vector<16x1xf32>
    %61 = vector.broadcast %60 : vector<16x1xf32> to vector<16x256xf32>
    %62 = arith.mulf %55, %61 : vector<16x256xf32>
    %cst_21 = arith.constant dense<0.000000e+00> : vector<256xf32>
    %63 = vector.multi_reduction <add>, %62, %cst_21 [0] : vector<16x256xf32> to vector<256xf32>
    %64 = vector.shape_cast %63 : vector<256xf32> to vector<1x256xf32>
    %cst_22 = arith.constant 2.560000e+02 : f32
    %65 = vector.broadcast %cst_22 : f32 to vector<1x256xf32>
    %66 = arith.mulf %64, %65 : vector<1x256xf32>
    %67 = tpu.reciprocal %66 {approx = true} : vector<1x256xf32> -> vector<1x256xf32>
    %68 = vector.broadcast %67 : vector<1x256xf32> to vector<16x256xf32>
    %69 = arith.mulf %62, %68 : vector<16x256xf32>
    %cst_23 = arith.constant dense<0.000000e+00> : vector<16xf32>
    %70 = vector.multi_reduction <add>, %69, %cst_23 [1] : vector<16x256xf32> to vector<16xf32>
    %71 = vector.shape_cast %70 : vector<16xf32> to vector<16x1xf32>
    %cst_24 = arith.constant 1.600000e+01 : f32
    %72 = vector.broadcast %cst_24 : f32 to vector<16x1xf32>
    %73 = arith.mulf %71, %72 : vector<16x1xf32>
    %74 = tpu.reciprocal %73 {approx = true} : vector<16x1xf32> -> vector<16x1xf32>
    %75 = vector.broadcast %74 : vector<16x1xf32> to vector<16x256xf32>
    %76 = arith.mulf %69, %75 : vector<16x256xf32>
    %cst_25 = arith.constant 1.600000e+01 : f32
    %77 = vector.broadcast %cst_25 : f32 to vector<16x256xf32>
    %78 = arith.mulf %76, %77 : vector<16x256xf32>
    %79 = vector.shape_cast %78 : vector<16x256xf32> to vector<2x8x256xf32>
    "tpu.trace_start"() <{level = 10 : i32, message = "bld,bvd->blv"}> : () -> ()
    %cst_26 = arith.constant dense<0.000000e+00> : vector<2x8x8xf32>
    %80 = tpu.matmul %10, %9, %cst_26 {dimension_numbers = #tpu.dot_dimension_numbers<[2], [2], [1], [1], [0, 0, 0, 1, 1, 1], [0], [0]>} : vector<2x8x128xf32>, vector<2x8x128xf32>, vector<2x8x8xf32> -> vector<2x8x8xf32>
    "tpu.trace_stop"() : () -> ()
    %cst_27 = arith.constant dense<0xFF800000> : vector<2x8xf32>
    %81 = vector.multi_reduction <maximumf>, %80, %cst_27 [2] : vector<2x8x8xf32> to vector<2x8xf32>
    %82 = vector.shape_cast %81 : vector<2x8xf32> to vector<2x8x1xf32>
    %83 = tpu.iota {dimensions = array<i32: 2>} : vector<2x8x8xi32>
    %84 = vector.broadcast %82 : vector<2x8x1xf32> to vector<2x8x8xf32>
    %85 = arith.cmpf oeq, %80, %84 : vector<2x8x8xf32>
    %c8_i32 = arith.constant 8 : i32
    %86 = vector.broadcast %c8_i32 : i32 to vector<2x8x8xi32>
    %87 = arith.select %85, %83, %86 : vector<2x8x8xi1>, vector<2x8x8xi32>
    %cst_28 = arith.constant dense<2147483647> : vector<2x8xi32>
    %88 = vector.multi_reduction <minsi>, %87, %cst_28 [2] : vector<2x8x8xi32> to vector<2x8xi32>
    %89 = vector.shape_cast %88 : vector<2x8xi32> to vector<2x8x1xi32>
    %90 = vector.broadcast %89 : vector<2x8x1xi32> to vector<2x8x8xi32>
    %91 = arith.cmpi eq, %83, %90 : vector<2x8x8xi32>
    %92 = arith.extui %91 : vector<2x8x8xi1> to vector<2x8x8xi32>
    %93 = arith.sitofp %92 : vector<2x8x8xi32> to vector<2x8x8xf32>
    "tpu.trace_start"() <{level = 10 : i32, message = "blv,bvk->blk"}> : () -> ()
    %cst_29 = arith.constant dense<0.000000e+00> : vector<2x8x256xf32>
    %94 = tpu.matmul %93, %79, %cst_29 {dimension_numbers = #tpu.dot_dimension_numbers<[2], [1], [1], [2], [0, 0, 0, 1, 1, 2], [0], [0]>} : vector<2x8x8xf32>, vector<2x8x256xf32>, vector<2x8x256xf32> -> vector<2x8x256xf32>
    "tpu.trace_stop"() : () -> ()
    %cst_30 = arith.constant dense<0xFF800000> : vector<2x8xf32>
    %95 = vector.multi_reduction <maximumf>, %21, %cst_30 [2] : vector<2x8x256xf32> to vector<2x8xf32>
    %96 = vector.shape_cast %95 : vector<2x8xf32> to vector<2x8x1xf32>
    %97 = vector.broadcast %96 : vector<2x8x1xf32> to vector<2x8x256xf32>
    %98 = arith.subf %21, %97 : vector<2x8x256xf32>
    %99 = vector.broadcast %96 : vector<2x8x1xf32> to vector<2x8x256xf32>
    %100 = arith.subf %21, %99 : vector<2x8x256xf32>
    %101 = math.exp %100 : vector<2x8x256xf32>
    %cst_31 = arith.constant dense<0.000000e+00> : vector<2x8xf32>
    %102 = vector.multi_reduction <add>, %101, %cst_31 [2] : vector<2x8x256xf32> to vector<2x8xf32>
    %103 = vector.shape_cast %102 : vector<2x8xf32> to vector<2x8x1xf32>
    %104 = math.log %103 : vector<2x8x1xf32>
    %105 = vector.broadcast %104 : vector<2x8x1xf32> to vector<2x8x256xf32>
    %106 = arith.subf %98, %105 : vector<2x8x256xf32>
    %cst_32 = arith.constant 0.000000e+00 : f32
    %107 = vector.broadcast %cst_32 : f32 to vector<2x8x256xf32>
    %108 = arith.subf %107, %94 : vector<2x8x256xf32>
    %109 = arith.mulf %108, %106 : vector<2x8x256xf32>
    %cst_33 = arith.constant dense<0.000000e+00> : vector<2x8xf32>
    %110 = vector.multi_reduction <add>, %109, %cst_33 [2] : vector<2x8x256xf32> to vector<2x8xf32>
    %c0_34 = arith.constant 0 : index
    %c0_35 = arith.constant 0 : index
    %111 = vector.load %arg0[%c0_34, %c0_35] : memref<2x1xi32, #tpu.memory_space<vmem>>, vector<2x1xi32>
    %112 = tpu.iota {dimensions = array<i32: 1>} : vector<2x8xi32>
    %113 = vector.broadcast %111 : vector<2x1xi32> to vector<2x8xi32>
    %114 = arith.cmpi slt, %112, %113 : vector<2x8xi32>
    %115 = arith.extui %114 : vector<2x8xi1> to vector<2x8xi32>
    %116 = arith.sitofp %115 : vector<2x8xi32> to vector<2x8xf32>
    %117 = arith.mulf %110, %116 : vector<2x8xf32>
    %cst_36 = arith.constant dense<0.000000e+00> : vector<2xf32>
    %118 = vector.multi_reduction <add>, %117, %cst_36 [1] : vector<2x8xf32> to vector<2xf32>
    %119 = vector.shape_cast %118 : vector<2xf32> to vector<2x1xf32>
    %120 = arith.sitofp %111 : vector<2x1xi32> to vector<2x1xf32>
    %121 = arith.divf %119, %120 : vector<2x1xf32>
    %122 = vector.shape_cast %121 : vector<2x1xf32> to vector<1x2x1xf32>
    %cst_37 = arith.constant dense<0.000000e+00> : vector<1xf32>
    %123 = vector.multi_reduction <add>, %122, %cst_37 [1, 2] : vector<1x2x1xf32> to vector<1xf32>
    %124 = vector.shape_cast %123 : vector<1xf32> to vector<1x1x1xf32>
    %125 = vector.extract %124[0, 0, 0] : f32 from vector<1x1x1xf32>
    %cst_38 = arith.constant 2.000000e+00 : f32
    %126 = arith.divf %125, %cst_38 : f32
    %c0_39 = arith.constant 0 : index
    %c0_40 = arith.constant 0 : index
    %127 = memref.load %arg4[%c0_39, %c0_40] : memref<1x1xf32, #tpu.memory_space<smem>>
    memref.store %126, %arg4[%c0_39, %c0_40] : memref<1x1xf32, #tpu.memory_space<smem>>
    return
  }
}

</mosaic_0001>

<bundles_post_ra>
// kernel: tpu_custom_call.1
= control target key start
LH: loop header
LB: loop body
LE: loop exit
PB: predicated region body
PF: predicated region fallthrough
CT: control target
= control target key end

     0   :  { %9 = vsyncpa [#allocation3], 0  ;;  %s1649_s0 = inlined_call_operand.vmem [shape: s32[2,1], index: 0, kind: input, shape index: {}]   ;;  %s1650_s1 = inlined_call_operand.hbm [shape: f32[2,8,128], index: 1, kind: input, shape index: {}]   ;;  %s1651_s2 = inlined_call_operand.hbm [shape: f32[2,8,128], index: 2, kind: input, shape index: {}]   ;;  %s1652_s3 = inlined_call_operand.hbm [shape: f32[256,128], index: 3, kind: input, shape index: {}]   ;;  %s1653_s4 = inlined_call_operand.hbm [shape: f32[1,1], index: 4, kind: output, shape index: {}]  }
   0x1   :  { %10 = vsyncpa [#allocation6], 0 }
   0x2   :  { %11 = vsyncpa [#allocation4], 0  ;;  %s1303_s15 = smov [#allocation5]   ;;  %s1304_s17 = smov [#allocation2]  }
   0x3   :  { %s31_s16 = sshll.u32 %s1303_s15, 4  ;;  %s19_s18 = sshll.u32 %s1304_s17, 4  ;;  %s32_s16 = int_to_ptr.vmem [resolvable:$true] %s31_s16  ;;  %s1337_s18 = int_to_ptr.vmem [resolvable:$true] %s19_s18 }
   0x4   :  { %s1221_s21 = scalar_lea.hbm %s1651_s2, 256 }
   0x5   :  { %p1222_p0 = scmp.ne.s32.totalorder %s1651_s2, %s1221_s21  ;;  %p1225_p1 = scmp.lt.u32.totalorder %s1221_s21, %s1651_s2 }
   0x7   :  { %p1227_p2 = pnand %p1225_p1, %p1222_p0 }
   0x9   :  { %1230 = shalt.err (!%p1227_p2)
}
   0xa   :  { %s1231_s26 = scalar_lea.vmem %s32_s16, 256  ;;  %p1236_p4 = scmp.lt.s32.totalorder %s32_s16, %s32_s16 }
   0xb   :  { %p1232_p3 = scmp.ne.s32.totalorder %s32_s16, %s1231_s26  ;;  %p1237_p5 = scmp.lt.s32.totalorder %s1231_s26, %s1231_s26 }
   0xd   :  { %p1238_p6 = por %p1237_p5, %p1236_p4 }
   0xf   :  { %p1239_p7 = pnand %p1238_p6, %p1232_p3 }
  0x11   :  { %1242 = shalt.err (!%p1239_p7)
}
  0x12   :  { %s1305_s27 = smov 128   ;;  %s1306_s28 = smov 8  }
  0x13   :  { %37 = dma.hbm_to_vmem [thread:$0]  %s1651_s2, 256, %s32_s16, [#allocation6], %s1305_s27, %s1305_s27, %s1306_s28  }
  0x14   :  { %s1243_s7 = scalar_lea.hbm %s1650_s1, 256 }
  0x15   :  { %p1244_p8 = scmp.ne.s32.totalorder %s1650_s1, %s1243_s7  ;;  %p1247_p9 = scmp.lt.u32.totalorder %s1243_s7, %s1650_s1 }
  0x17   :  { %p1249_p10 = pnand %p1247_p9, %p1244_p8 }
  0x19   :  { %1252 = shalt.err (!%p1249_p10)
}
  0x1a   :  { %s1253_s12 = scalar_lea.vmem %s1337_s18, 256  ;;  %p1258_p12 = scmp.lt.s32.totalorder %s1337_s18, %s1337_s18 }
  0x1b   :  { %p1254_p11 = scmp.ne.s32.totalorder %s1337_s18, %s1253_s12  ;;  %p1259_p13 = scmp.lt.s32.totalorder %s1253_s12, %s1253_s12 }
  0x1d   :  { %p1260_p0 = por %p1259_p13, %p1258_p12 }
  0x1f   :  { %p1261_p1 = pnand %p1260_p0, %p1254_p11 }
  0x21   :  { %1264 = shalt.err (!%p1261_p1)
}
  0x22   :  { %25 = dma.hbm_to_vmem [thread:$0]  %s1650_s1, 256, %s1337_s18, [#allocation3], %s1305_s27, %s1305_s27, %s1306_s28  }
  0x23   :  { %s1307_s14 = smov [#allocation7]   ;;  %s1265_s19 = scalar_lea.hbm %s1652_s3, 4096 }
  0x24   :  { %s43_s15 = sshll.u32 %s1307_s14, 4  ;;  %p1266_p2 = scmp.ne.s32.totalorder %s1652_s3, %s1265_s19  ;;  %s44_s15 = int_to_ptr.vmem [resolvable:$true] %s43_s15 }
  0x25   :  { %p1269_p3 = scmp.lt.u32.totalorder %s1265_s19, %s1652_s3 }
  0x27   :  { %p1271_p4 = pnand %p1269_p3, %p1266_p2 }
  0x29   :  { %1274 = shalt.err (!%p1271_p4)
}
  0x2a   :  { %s1275_s24 = scalar_lea.vmem %s44_s15, 4096  ;;  %p1280_p6 = scmp.lt.s32.totalorder %s44_s15, %s44_s15 }
  0x2b   :  { %p1276_p5 = scmp.ne.s32.totalorder %s44_s15, %s1275_s24  ;;  %p1281_p7 = scmp.lt.s32.totalorder %s1275_s24, %s1275_s24 }
  0x2d   :  { %p1282_p8 = por %p1281_p7, %p1280_p6 }
  0x2f   :  { %p1283_p9 = pnand %p1282_p8, %p1276_p5 }
  0x31   :  { %1286 = shalt.err (!%p1283_p9)
}
  0x32   :  { %49 = dma.hbm_to_vmem [thread:$0]  %s1652_s3, 4096, %s44_s15, [#allocation6], %s1305_s27, %s1305_s27, %s1306_s28  }
  0x33   :  { %1297 = dma.done.wait [#allocation3], 256  }
  0x34   :  { %1298 = vsyncadd [#allocation3], 4294967040 }
  0x35   :  { %1299 = dma.done.wait [#allocation6], 4352  }
  0x36   :  { %1300 = vsyncadd [#allocation6], 4294962944  ;;  %v1389_v0 = vld [vmem:[#allocation7 + $0x80] sm:$0xff]  ;;  %v1393_v2 = vld [vmem:[#allocation7 + $0x88] sm:$0xff]  ;;  %vm1309_vm0 = vmmov 0   ;;  %vm675_vm1 = vcmask 64512  }
  0x37   :  { %v1391_v1 = vld [vmem:[#allocation7] sm:$0xff]  ;;  %v107_v3 = vmul.f32 %v1389_v0, %v1389_v0  ;;  %v1399_v5 = vld [vmem:[#allocation7 + $0x8] sm:$0xff]  ;;  %v108_v6 = vmul.f32 %v1393_v2, %v1393_v2  ;;  %v1405_v8 = vld [vmem:[#allocation7 + $0x90] sm:$0xff]  ;;  %vm960_vm9 = vcmask 1041409   ;;  %vm963_vm10 = vcmask 58368   ;;  %s1287_s5 = scalar_lea.hbm %s1653_s4, 16 }
  0x38   :  { %v91_v4 = vmul.f32 %v1391_v1, %v1391_v1  ;;  %v92_v7 = vmul.f32 %v1399_v5, %v1399_v5  ;;  %v1407_v9 = vld [vmem:[#allocation7 + $0x98] sm:$0xff]  ;;  %v109_v10 = vmul.f32 %v1405_v8, %v1405_v8  ;;  %v1413_v12 = vld [vmem:[#allocation7 + $0x10] sm:$0xff]  ;;  %v1421_v16 = vld [vmem:[#allocation7 + $0xa0] sm:$0xff]  ;;  %vm970_vm11 = vcmask 1024   ;;  %p1288_p10 = scmp.ne.s32.totalorder %s1653_s4, %s1287_s5  ;;  %p1291_p11 = scmp.lt.u32.totalorder %s1287_s5, %s1653_s4 }
  0x39   :  { %155 = vadd.xlane.f32.xlu0 %v107_v3  ;;  %v110_v11 = vmul.f32 %v1407_v9, %v1407_v9  ;;  %v1415_v13 = vld [vmem:[#allocation7 + $0x18] sm:$0xff]  ;;  %v93_v14 = vmul.f32 %v1413_v12, %v1413_v12  ;;  %v1423_v17 = vld [vmem:[#allocation7 + $0xa8] sm:$0xff]  ;;  %v111_v18 = vmul.f32 %v1421_v16, %v1421_v16  ;;  %v1429_v20 = vld [vmem:[#allocation7 + $0x20] sm:$0xff] }
  0x3a   :  { %123 = vadd.xlane.f32.xlu1 %v91_v4  ;;  %v94_v15 = vmul.f32 %v1415_v13, %v1415_v13  ;;  %v112_v19 = vmul.f32 %v1423_v17, %v1423_v17  ;;  %v1431_v21 = vld [vmem:[#allocation7 + $0x28] sm:$0xff]  ;;  %v95_v22 = vmul.f32 %v1429_v20, %v1429_v20  ;;  %v1437_v24 = vld [vmem:[#allocation7 + $0xb0] sm:$0xff]  ;;  %v1439_v25 = vld [vmem:[#allocation7 + $0xb8] sm:$0xff]  ;;  %p1293_p12 = pnand %p1291_p11, %p1288_p10 }
  0x3b   :  { %v96_v23 = vmul.f32 %v1431_v21, %v1431_v21  ;;  %v113_v26 = vmul.f32 %v1437_v24, %v1437_v24  ;;  %v114_v27 = vmul.f32 %v1439_v25, %v1439_v25  ;;  %v1445_v28 = vld [vmem:[#allocation7 + $0x30] sm:$0xff]  ;;  %v1447_v29 = vld [vmem:[#allocation7 + $0x38] sm:$0xff]  ;;  %v1453_v32 = vld [vmem:[#allocation7 + $0xc0] sm:$0xff] }
  0x3c   :  { %v97_v30 = vmul.f32 %v1445_v28, %v1445_v28  ;;  %v98_v31 = vmul.f32 %v1447_v29, %v1447_v29  ;;  %v1455_v33 = vld [vmem:[#allocation7 + $0xc8] sm:$0xff]  ;;  %v115_v34 = vmul.f32 %v1453_v32, %v1453_v32  ;;  %v1461_v36 = vld [vmem:[#allocation7 + $0x40] sm:$0xff]  ;;  %v1469_v40 = vld [vmem:[#allocation7 + $0xd0] sm:$0xff] }
  0x3d   :  { %157 = vadd.xlane.f32.xlu0 %v108_v6  ;;  %v116_v35 = vmul.f32 %v1455_v33, %v1455_v33  ;;  %v1463_v37 = vld [vmem:[#allocation7 + $0x48] sm:$0xff]  ;;  %v99_v38 = vmul.f32 %v1461_v36, %v1461_v36  ;;  %v1471_v41 = vld [vmem:[#allocation7 + $0xd8] sm:$0xff]  ;;  %v117_v42 = vmul.f32 %v1469_v40, %v1469_v40  ;;  %v1477_v44 = vld [vmem:[#allocation7 + $0x50] sm:$0xff] }
  0x3e   :  { %125 = vadd.xlane.f32.xlu1 %v92_v7  ;;  %v100_v39 = vmul.f32 %v1463_v37, %v1463_v37  ;;  %v118_v43 = vmul.f32 %v1471_v41, %v1471_v41  ;;  %v1479_v45 = vld [vmem:[#allocation7 + $0x58] sm:$0xff]  ;;  %v101_v46 = vmul.f32 %v1477_v44, %v1477_v44  ;;  %v1485_v48 = vld [vmem:[#allocation7 + $0xe0] sm:$0xff]  ;;  %v1487_v49 = vld [vmem:[#allocation7 + $0xe8] sm:$0xff] }
  0x3f   :  { %v102_v47 = vmul.f32 %v1479_v45, %v1479_v45  ;;  %v119_v50 = vmul.f32 %v1485_v48, %v1485_v48  ;;  %v120_v51 = vmul.f32 %v1487_v49, %v1487_v49  ;;  %v1493_v52 = vld [vmem:[#allocation7 + $0x60] sm:$0xff]  ;;  %v1495_v53 = vld [vmem:[#allocation7 + $0x68] sm:$0xff]  ;;  %v1501_v56 = vld [vmem:[#allocation7 + $0xf0] sm:$0xff] }
  0x40   :  { %v103_v54 = vmul.f32 %v1493_v52, %v1493_v52  ;;  %v104_v55 = vmul.f32 %v1495_v53, %v1495_v53  ;;  %v1503_v57 = vld [vmem:[#allocation7 + $0xf8] sm:$0xff]  ;;  %v121_v58 = vmul.f32 %v1501_v56, %v1501_v56  ;;  %v1509_v60 = vld [vmem:[#allocation7 + $0x70] sm:$0xff]  ;;  %v1517_v3 = vld [vmem:[#allocation2] sm:$0xff] }
  0x41   :  { %159 = vadd.xlane.f32.xlu0 %v109_v10  ;;  %v122_v59 = vmul.f32 %v1503_v57, %v1503_v57  ;;  %v1511_v61 = vld [vmem:[#allocation7 + $0x78] sm:$0xff]  ;;  %v105_v62 = vmul.f32 %v1509_v60, %v1509_v60  ;;  %v1520_v4 = vmul.f32 20.0, %v1517_v3 }
  0x42   :  { %161 = vadd.xlane.f32.xlu1 %v110_v11  ;;  %v106_v63 = vmul.f32 %v1511_v61, %v1511_v61 }
  0x43   :  { %1038 = vmatprep.mubr.f32.mxu0 %v1520_v4 }
  0x45   :  { %127 = vadd.xlane.f32.xlu0 %v93_v14 }
  0x46   :  { %129 = vadd.xlane.f32.xlu1 %v94_v15 }
  0x49   :  { %163 = vadd.xlane.f32.xlu0 %v111_v18 }
  0x4a   :  { %165 = vadd.xlane.f32.xlu1 %v112_v19 }
  0x4d   :  { %131 = vadd.xlane.f32.xlu0 %v95_v22 }
  0x4e   :  { %133 = vadd.xlane.f32.xlu1 %v96_v23 }
  0x51   :  { %167 = vadd.xlane.f32.xlu0 %v113_v26 }
  0x52   :  { %169 = vadd.xlane.f32.xlu1 %v114_v27 }
  0x55   :  { %135 = vadd.xlane.f32.xlu0 %v97_v30 }
  0x56   :  { %137 = vadd.xlane.f32.xlu1 %v98_v31 }
  0x59   :  { %171 = vadd.xlane.f32.xlu0 %v115_v34 }
  0x5a   :  { %173 = vadd.xlane.f32.xlu1 %v116_v35 }
  0x5d   :  { %139 = vadd.xlane.f32.xlu0 %v99_v38 }
  0x5e   :  { %141 = vadd.xlane.f32.xlu1 %v100_v39 }
  0x61   :  { %175 = vadd.xlane.f32.xlu0 %v117_v42 }
  0x62   :  { %177 = vadd.xlane.f32.xlu1 %v118_v43 }
  0x65   :  { %143 = vadd.xlane.f32.xlu0 %v101_v46 }
  0x66   :  { %145 = vadd.xlane.f32.xlu1 %v102_v47 }
  0x69   :  { %179 = vadd.xlane.f32.xlu0 %v119_v50 }
  0x6a   :  { %181 = vadd.xlane.f32.xlu1 %v120_v51 }
  0x6d   :  { %147 = vadd.xlane.f32.xlu0 %v103_v54 }
  0x6e   :  { %149 = vadd.xlane.f32.xlu1 %v104_v55 }
  0x71   :  { %183 = vadd.xlane.f32.xlu0 %v121_v58 }
  0x72   :  { %185 = vadd.xlane.f32.xlu1 %v122_v59 }
  0x75   :  { %151 = vadd.xlane.f32.xlu0 %v105_v62 }
  0x76   :  { %153 = vadd.xlane.f32.xlu1 %v106_v63 }
  0xc6   :  { %v156_v6 = vpop.xlane.xlu0 %155 }
  0xc7   :  { %v124_v7 = vpop.xlane.xlu1 %123  ;;  %v203_v10 = vmax.f32 %v156_v6, 1e-24 }
  0xc8   :  { %v187_v11 = vmax.f32 %v124_v7, 1e-24 }
  0xc9   :  { %1109 = vrsqrt.f32 %v203_v10 }
  0xca   :  { %v158_v14 = vpop.xlane.xlu0 %157  ;;  %1111 = vrsqrt.f32 %v187_v11 }
  0xcb   :  { %v126_v15 = vpop.xlane.xlu1 %125  ;;  %v204_v18 = vmax.f32 %v158_v14, 1e-24 }
  0xcc   :  { %v188_v19 = vmax.f32 %v126_v15, 1e-24 }
  0xcd   :  { %1113 = vrsqrt.f32 %v204_v18 }
  0xce   :  { %1115 = vrsqrt.f32 %v188_v19  ;;  %v160_v22 = vpop.xlane.xlu0 %159 }
  0xcf   :  { %v162_v23 = vpop.xlane.xlu1 %161  ;;  %v205_v26 = vmax.f32 %v160_v22, 1e-24 }
  0xd0   :  { %v206_v27 = vmax.f32 %v162_v23, 1e-24 }
  0xd1   :  { %1117 = vrsqrt.f32 %v205_v26 }
  0xd2   :  { %1119 = vrsqrt.f32 %v206_v27  ;;  %v128_v30 = vpop.xlane.xlu0 %127 }
  0xd3   :  { %v130_v31 = vpop.xlane.xlu1 %129  ;;  %v189_v34 = vmax.f32 %v128_v30, 1e-24  ;;  %v1110_v38 = vpop.eup %1109 }
  0xd4   :  { %v190_v35 = vmax.f32 %v130_v31, 1e-24  ;;  %v1112_v39 = vpop.eup %1111  ;;  %v267_v54 = vmul.f32 %v1110_v38, %v1389_v0 }
  0xd5   :  { %1121 = vrsqrt.f32 %v189_v34  ;;  %v251_v58 = vmul.f32 %v1112_v39, %v1391_v1 }
  0xd6   :  { %1123 = vrsqrt.f32 %v190_v35  ;;  %v164_v42 = vpop.xlane.xlu0 %163 }
  0xd7   :  { %v166_v43 = vpop.xlane.xlu1 %165  ;;  %v1114_v46 = vpop.eup %1113  ;;  %v207_v47 = vmax.f32 %v164_v42, 1e-24 }
  0xd8   :  { %v208_v50 = vmax.f32 %v166_v43, 1e-24  ;;  %v1116_v51 = vpop.eup %1115  ;;  %v268_v55 = vmul.f32 %v1114_v46, %v1393_v2 }
  0xd9   :  { %1125 = vrsqrt.f32 %v207_v47  ;;  %v252_v59 = vmul.f32 %v1116_v51, %v1399_v5 }
  0xda   :  { %1127 = vrsqrt.f32 %v208_v50  ;;  %v132_v62 = vpop.xlane.xlu0 %131  ;;  %v1060_v6 = vpack.c.bf16 %v268_v55, %v267_v54 }
  0xdb   :  { %v134_v63 = vpop.xlane.xlu1 %133  ;;  %v1118_v7 = vpop.eup %1117  ;;  %v191_v10 = vmax.f32 %v132_v62, 1e-24  ;;  %v1062_v14 = vpack.c.bf16 %v252_v59, %v251_v58 }
  0xdc   :  { %v192_v11 = vmax.f32 %v134_v63, 1e-24  ;;  %v1120_v15 = vpop.eup %1119  ;;  %1061 = vmatprep.subr.bf16.mxu0 %v1060_v6  ;;  %v269_v18 = vmul.f32 %v1118_v7, %v1405_v8 }
  0xdd   :  { %1129 = vrsqrt.f32 %v191_v10  ;;  %1063 = vmatpush3.bf16.xpose.msra.mxu0 %v1062_v14  ;;  %v270_v0 = vmul.f32 %v1120_v15, %v1407_v9 }
  0xde   :  { %1131 = vrsqrt.f32 %v192_v11  ;;  %v168_v1 = vpop.xlane.xlu0 %167 }
  0xdf   :  { %v170_v2 = vpop.xlane.xlu1 %169  ;;  %v1122_v5 = vpop.eup %1121  ;;  %v209_v19 = vmax.f32 %v168_v1, 1e-24  ;;  %v1064_v23 = vpack.c.bf16 %v270_v0, %v269_v18 }
  0xe0   :  { %v210_v22 = vmax.f32 %v170_v2, 1e-24  ;;  %v1124_v26 = vpop.eup %1123  ;;  %v253_v27 = vmul.f32 %v1122_v5, %v1413_v12 }
  0xe1   :  { %1133 = vrsqrt.f32 %v209_v19  ;;  %1065 = vmatprep.subr.bf16.mxu0 %v1064_v23  ;;  %v254_v30 = vmul.f32 %v1124_v26, %v1415_v13 }
  0xe2   :  { %1135 = vrsqrt.f32 %v210_v22  ;;  %v136_v8 = vpop.xlane.xlu0 %135 }
  0xe3   :  { %v138_v31 = vpop.xlane.xlu1 %137  ;;  %v1126_v34 = vpop.eup %1125  ;;  %v193_v35 = vmax.f32 %v136_v8, 1e-24  ;;  %v1066_v38 = vpack.c.bf16 %v254_v30, %v253_v27 }
  0xe4   :  { %v194_v9 = vmax.f32 %v138_v31, 1e-24  ;;  %v1128_v39 = vpop.eup %1127  ;;  %v271_v42 = vmul.f32 %v1126_v34, %v1421_v16 }
  0xe5   :  { %1137 = vrsqrt.f32 %v193_v35  ;;  %1067 = vmatpush3.bf16.xpose.msra.mxu0 %v1066_v38  ;;  %v272_v43 = vmul.f32 %v1128_v39, %v1423_v17 }
  0xe6   :  { %1139 = vrsqrt.f32 %v194_v9  ;;  %v172_v12 = vpop.xlane.xlu0 %171 }
  0xe7   :  { %v174_v46 = vpop.xlane.xlu1 %173  ;;  %v1130_v47 = vpop.eup %1129  ;;  %v211_v50 = vmax.f32 %v172_v12, 1e-24  ;;  %v1068_v51 = vpack.c.bf16 %v272_v43, %v271_v42 }
  0xe8   :  { %v212_v13 = vmax.f32 %v174_v46, 1e-24  ;;  %v1132_v54 = vpop.eup %1131  ;;  %v255_v55 = vmul.f32 %v1130_v47, %v1429_v20 }
  0xe9   :  { %1141 = vrsqrt.f32 %v211_v50  ;;  %1069 = vmatprep.subr.bf16.mxu0 %v1068_v51  ;;  %v256_v58 = vmul.f32 %v1132_v54, %v1431_v21 }
  0xea   :  { %1143 = vrsqrt.f32 %v212_v13  ;;  %v140_v16 = vpop.xlane.xlu0 %139 }
  0xeb   :  { %v142_v59 = vpop.xlane.xlu1 %141  ;;  %v1134_v62 = vpop.eup %1133  ;;  %v195_v63 = vmax.f32 %v140_v16, 1e-24  ;;  %v1070_v6 = vpack.c.bf16 %v256_v58, %v255_v55 }
  0xec   :  { %v196_v17 = vmax.f32 %v142_v59, 1e-24  ;;  %v1136_v7 = vpop.eup %1135  ;;  %v273_v10 = vmul.f32 %v1134_v62, %v1437_v24 }
  0xed   :  { %1145 = vrsqrt.f32 %v195_v63  ;;  %1071 = vmatpush3.bf16.xpose.msra.mxu0 %v1070_v6  ;;  %v274_v11 = vmul.f32 %v1136_v7, %v1439_v25 }
  0xee   :  { %1147 = vrsqrt.f32 %v196_v17  ;;  %v176_v20 = vpop.xlane.xlu0 %175 }
  0xef   :  { %v178_v14 = vpop.xlane.xlu1 %177  ;;  %v1138_v15 = vpop.eup %1137  ;;  %v213_v18 = vmax.f32 %v176_v20, 1e-24  ;;  %v1072_v0 = vpack.c.bf16 %v274_v11, %v273_v10 }
  0xf0   :  { %v214_v21 = vmax.f32 %v178_v14, 1e-24  ;;  %v1140_v1 = vpop.eup %1139  ;;  %v257_v2 = vmul.f32 %v1138_v15, %v1445_v28 }
  0xf1   :  { %1149 = vrsqrt.f32 %v213_v18  ;;  %1073 = vmatprep.subr.bf16.mxu0 %v1072_v0  ;;  %v258_v5 = vmul.f32 %v1140_v1, %v1447_v29 }
  0xf2   :  { %1151 = vrsqrt.f32 %v214_v21  ;;  %v144_v24 = vpop.xlane.xlu0 %143 }
  0xf3   :  { %v146_v19 = vpop.xlane.xlu1 %145  ;;  %v1142_v22 = vpop.eup %1141  ;;  %v197_v23 = vmax.f32 %v144_v24, 1e-24  ;;  %v1074_v26 = vpack.c.bf16 %v258_v5, %v257_v2 }
  0xf4   :  { %v198_v25 = vmax.f32 %v146_v19, 1e-24  ;;  %v1144_v27 = vpop.eup %1143  ;;  %v275_v30 = vmul.f32 %v1142_v22, %v1453_v32 }
  0xf5   :  { %1153 = vrsqrt.f32 %v197_v23  ;;  %1075 = vmatpush3.bf16.xpose.msra.mxu0 %v1074_v26  ;;  %v276_v8 = vmul.f32 %v1144_v27, %v1455_v33 }
  0xf6   :  { %1155 = vrsqrt.f32 %v198_v25  ;;  %v180_v28 = vpop.xlane.xlu0 %179  ;;  %v284_v25 = vld [vmem:[#allocation2 + $0x8] sm:$0xff] }
  0xf7   :  { %v182_v31 = vpop.xlane.xlu1 %181  ;;  %v1146_v34 = vpop.eup %1145  ;;  %v215_v35 = vmax.f32 %v180_v28, 1e-24  ;;  %v1076_v9 = vpack.c.bf16 %v276_v8, %v275_v30 }
  0xf8   :  { %v216_v29 = vmax.f32 %v182_v31, 1e-24  ;;  %v1148_v38 = vpop.eup %1147  ;;  %v259_v39 = vmul.f32 %v1146_v34, %v1461_v36  ;;  %v1308_v31 = vmov 0.0  }
  0xf9   :  { %1157 = vrsqrt.f32 %v215_v35  ;;  %1077 = vmatprep.subr.bf16.mxu0 %v1076_v9  ;;  %v260_v42 = vmul.f32 %v1148_v38, %v1463_v37  ;;  %1050 = vmatprep.subr.mxu1 %v1308_v31 }
  0xfa   :  { %1159 = vrsqrt.f32 %v216_v29  ;;  %v148_v32 = vpop.xlane.xlu0 %147  ;;  %1052 = vmatprep.mubr.msk.f32.mxu1 %vm1309_vm0, %v1308_v31  ;;  %1051 = vmatpush3.xpose.msra.mxu1 %v1517_v3 }
  0xfb   :  { %v150_v43 = vpop.xlane.xlu1 %149  ;;  %v1150_v12 = vpop.eup %1149  ;;  %v199_v46 = vmax.f32 %v148_v32, 1e-24  ;;  %v1078_v47 = vpack.c.bf16 %v260_v42, %v259_v39  ;;  %1055 = vmatprep.subr.mxu1 %v1308_v31 }
  0xfc   :  { %v200_v33 = vmax.f32 %v150_v43, 1e-24  ;;  %v1152_v50 = vpop.eup %1151  ;;  %v277_v13 = vmul.f32 %v1150_v12, %v1469_v40 }
  0xfd   :  { %1161 = vrsqrt.f32 %v199_v46  ;;  %1079 = vmatpush3.bf16.xpose.msra.mxu0 %v1078_v47  ;;  %v278_v51 = vmul.f32 %v1152_v50, %v1471_v41 }
  0xfe   :  { %1163 = vrsqrt.f32 %v200_v33  ;;  %v184_v36 = vpop.xlane.xlu0 %183 }
  0xff   :  { %v186_v54 = vpop.xlane.xlu1 %185  ;;  %v1154_v55 = vpop.eup %1153  ;;  %v217_v58 = vmax.f32 %v184_v36, 1e-24  ;;  %v1080_v16 = vpack.c.bf16 %v278_v51, %v277_v13 }
 0x100   :  { %v218_v37 = vmax.f32 %v186_v54, 1e-24  ;;  %v1156_v59 = vpop.eup %1155  ;;  %v261_v62 = vmul.f32 %v1154_v55, %v1477_v44 }
 0x101   :  { %1165 = vrsqrt.f32 %v217_v58  ;;  %1081 = vmatprep.subr.bf16.mxu0 %v1080_v16  ;;  %v262_v63 = vmul.f32 %v1156_v59, %v1479_v45 }
 0x102   :  { %1167 = vrsqrt.f32 %v218_v37  ;;  %v152_v40 = vpop.xlane.xlu0 %151 }
 0x103   :  { %v154_v17 = vpop.xlane.xlu1 %153  ;;  %v1158_v6 = vpop.eup %1157  ;;  %v201_v7 = vmax.f32 %v152_v40, 1e-24  ;;  %v1082_v10 = vpack.c.bf16 %v262_v63, %v261_v62 }
 0x104   :  { %v202_v41 = vmax.f32 %v154_v17, 1e-24  ;;  %v1160_v11 = vpop.eup %1159  ;;  %v279_v20 = vmul.f32 %v1158_v6, %v1485_v48 }
 0x105   :  { %1169 = vrsqrt.f32 %v201_v7  ;;  %1083 = vmatpush3.bf16.xpose.msra.mxu0 %v1082_v10  ;;  %v280_v14 = vmul.f32 %v1160_v11, %v1487_v49 }
 0x106   :  { %1171 = vrsqrt.f32 %v202_v41 }
 0x107   :  { %v1162_v44 = vpop.eup %1161  ;;  %v1084_v15 = vpack.c.bf16 %v280_v14, %v279_v20 }
 0x108   :  { %v1164_v18 = vpop.eup %1163  ;;  %v263_v45 = vmul.f32 %v1162_v44, %v1493_v52 }
 0x109   :  { %1085 = vmatprep.subr.bf16.mxu0 %v1084_v15  ;;  %v264_v21 = vmul.f32 %v1164_v18, %v1495_v53  ;;  %v288_v53 = vmul.f32 20.0, %v284_v25 }
 0x10b   :  { %v1166_v0 = vpop.eup %1165  ;;  %v1086_v1 = vpack.c.bf16 %v264_v21, %v263_v45 }
 0x10c   :  { %v1168_v2 = vpop.eup %1167  ;;  %v281_v5 = vmul.f32 %v1166_v0, %v1501_v56 }
 0x10d   :  { %1087 = vmatpush3.bf16.xpose.msra.mxu0 %v1086_v1  ;;  %v282_v48 = vmul.f32 %v1168_v2, %v1503_v57 }
 0x10f   :  { %v1170_v24 = vpop.eup %1169  ;;  %v1088_v19 = vpack.c.bf16 %v282_v48, %v281_v5 }
 0x110   :  { %v1172_v49 = vpop.eup %1171  ;;  %v265_v22 = vmul.f32 %v1170_v24, %v1509_v60  ;;  %v285_v60 = vld [vmem:[#allocation5] sm:$0xff] }
 0x111   :  { %1089 = vmatprep.subr.bf16.mxu0 %v1088_v19  ;;  %v266_v23 = vmul.f32 %v1172_v49, %v1511_v61  ;;  %v289_v61 = vmul.f32 10.0, %v285_v60  ;;  %1053 = vmatmul.mubr.f32.vlgmr.msra.gmra.mrb[0].mxu1 %v285_v60 }
 0x112   :  { %1056 = vmatpush3.xpose.msra.mxu1 %v284_v25  ;;  %1057 = vmatprep.mubr.msk.f32.mxu1 %vm1309_vm0, %v1308_v31 }
 0x113   :  { %v1090_v52 = vpack.c.bf16 %v266_v23, %v265_v22 }
 0x115   :  { %1091 = vmatpush3.bf16.xpose.msra.mxu0 %v1090_v52 }
 0x11c   :  { %1039 = vmatmul.mubr.f32.vlgmr.msra.gmra.mrb[0].mxu0 %v1520_v4  ;;  %v1561_v4 = vld [vmem:[#allocation5 + $0x8] sm:$0xff] }
 0x11d   :  { %1040 = vmatprep.mubr.f32.mxu0 %v288_v53  ;;  %1058 = vmatmul.mubr.f32.vlgmr.msra.gmra.mrb[2].mxu1 %v1561_v4 }
 0x11e   :  { %791 = vmatprep.mubr.f32.mxu1 %v1308_v31 }
 0x120   :  { %1041 = vmatmul.mubr.f32.gmra.mrb[2].mxu0 %v288_v53 }
 0x121   :  { %1042 = vmatprep.mubr.f32.mxu0 %v289_v61 }
 0x124   :  { %1043 = vmatmul.mubr.f32.gmra.mrb[4].mxu0 %v289_v61 }
 0x1e4   :  { %v1565_v59 = vpop.f32.mrb[0].mxu1 }
 0x1e5   :  { %v1054_v62 = vpop.f32.mrb[1].mxu1 }
 0x1ef   :  { %v357_v56 = vpop.f32.mrb[0].mxu0 }
 0x1f0   :  { %v359_v26 = vpop.f32.mrb[1].mxu0  ;;  %v1567_v63 = vpop.f32.mrb[2].mxu1 }
 0x1f1   :  { %v380_v27 = vmax.f32 %v357_v56, %v359_v26  ;;  %v1059_v40 = vpop.f32.mrb[3].mxu1 }
 0x1f3   :  { %v363_v57 = vpop.f32.mrb[2].mxu0 }
 0x1f4   :  { %v365_v30 = vpop.f32.mrb[3].mxu0 }
 0x1f5   :  { %v381_v8 = vmax.f32 %v363_v57, %v365_v30 }
 0x1f7   :  { %v382_v28 = vmax.f32 %v380_v27, %v381_v8 }
 0x1f9   :  { %383 = vmax.xlane.f32.xlu0 %v382_v28 }
 0x286   :  { %v384_v34 = vpop.xlane.xlu0 %383 }
 0x287   :  { %v385_v35 = vrot.slane %v384_v34, 4 }
 0x289   :  { %v386_v29 = vmax.f32 %v384_v34, %v385_v35 }
 0x28b   :  { %v387_v9 = vrot.slane %v386_v29, 2 }
 0x28d   :  { %v388_v38 = vmax.f32 %v386_v29, %v387_v9  ;;  %v679_v29 = vsel %vm675_vm1, %v1567_v63, -inf  ;;  %v676_v9 = vsel %vm675_vm1, %v1565_v59, -inf }
 0x28f   :  { %v389_v3 = vrot.slane %v388_v38, 1 }
 0x291   :  { %v390_v39 = vmax.f32 %v388_v38, %v389_v3  ;;  %v290_v38 = vmul.f32 10.0, %v1561_v4 }
 0x293   :  { %1092 = vpush %v390_v39  ;;  %1044 = vmatprep.mubr.f32.mxu0 %v290_v38 }
 0x294   :  { %1045 = vmatmul.mubr.f32.gmra.mrb[6].mxu0 %v290_v38 }
 0x2c4   :  { %s1093_s3 = spop %1092 }
 0x2c5   :  { %v392_v42 = vstv %s1093_s3 }
 0x2c6   :  { %v393_v32 = vsub.f32 %v357_v56, %v392_v42  ;;  %v394_v43 = vsub.f32 %v359_v26, %v392_v42  ;;  %v395_v12 = vsub.f32 %v363_v57, %v392_v42  ;;  %v396_v46 = vsub.f32 %v365_v30, %v392_v42 }
 0x2c8   :  { %v397_v33 = vmul.f32 1.442695, %v393_v32  ;;  %v399_v47 = vmul.f32 1.442695, %v394_v43  ;;  %v401_v50 = vmul.f32 1.442695, %v395_v12 }
 0x2c9   :  { %v403_v13 = vmul.f32 1.442695, %v396_v46 }
 0x2ca   :  { %1173 = vpow2.f32 %v397_v33 }
 0x2cb   :  { %1175 = vpow2.f32 %v399_v47 }
 0x2cc   :  { %1177 = vpow2.f32 %v401_v50 }
 0x2cd   :  { %1179 = vpow2.f32 %v403_v13 }
 0x2d4   :  { %v1174_v51 = vpop.eup %1173 }
 0x2d5   :  { %v1176_v36 = vpop.eup %1175 }
 0x2d6   :  { %v405_v54 = vadd.f32 %v1176_v36, %v1174_v51  ;;  %v1178_v55 = vpop.eup %1177 }
 0x2d7   :  { %v1180_v37 = vpop.eup %1179 }
 0x2d8   :  { %v406_v58 = vadd.f32 %v1178_v55, %v405_v54 }
 0x2da   :  { %v407_v16 = vadd.f32 %v1180_v37, %v406_v58 }
 0x2dc   :  { %408 = vadd.xlane.f32.xlu1 %v407_v16 }
 0x369   :  { %v409_v17 = vpop.xlane.xlu1 %408 }
 0x36a   :  { %v410_v6 = vrot.slane %v409_v17, 4 }
 0x36c   :  { %v411_v7 = vadd.f32 %v410_v6, %v409_v17 }
 0x36e   :  { %v412_v41 = vrot.slane %v411_v7, 2 }
 0x370   :  { %v413_v10 = vadd.f32 %v412_v41, %v411_v7 }
 0x372   :  { %v414_v11 = vrot.slane %v413_v10, 1 }
 0x374   :  { %v415_v20 = vadd.f32 %v414_v11, %v413_v10  ;;  %v682_v11 = vlaneseq }
 0x376   :  { %1094 = vpush %v415_v20 }
 0x3a7   :  { %s1095_s25 = spop %1094 }
 0x3a8   :  { %v417_v14 = vstv %s1095_s25 }
 0x3a9   :  { %1181 = vrcp.f32 %v417_v14 }
 0x3b3   :  { %v1182_v44 = vpop.eup %1181 }
 0x3b4   :  { %v419_v15 = vmul.f32 %v1182_v44, %v1174_v51  ;;  %v420_v18 = vmul.f32 %v1182_v44, %v1176_v36  ;;  %v421_v45 = vmul.f32 %v1182_v44, %v1178_v55  ;;  %v422_v21 = vmul.f32 %v1182_v44, %v1180_v37 }
 0x3b5   :  { %v1575_v44 = vand.u32 127, %v682_v11 }
 0x3b6   :  { %v423_v0 = vadd.f32 %v421_v45, %v419_v15  ;;  %v430_v1 = vadd.f32 %v422_v21, %v420_v18 }
 0x3b8   :  { %v424_v2 = vrot.slane %v423_v0, 4  ;;  %v431_v5 = vrot.slane %v430_v1, 4 }
 0x3ba   :  { %v425_v48 = vadd.f32 %v424_v2, %v423_v0  ;;  %v432_v24 = vadd.f32 %v431_v5, %v430_v1 }
 0x3bc   :  { %v426_v19 = vrot.slane %v425_v48, 2  ;;  %v433_v49 = vrot.slane %v432_v24, 2 }
 0x3be   :  { %v427_v22 = vadd.f32 %v426_v19, %v425_v48  ;;  %v434_v23 = vadd.f32 %v433_v49, %v432_v24 }
 0x3c0   :  { %v428_v52 = vrot.slane %v427_v22, 1  ;;  %v435_v25 = vrot.slane %v434_v23, 1 }
 0x3c2   :  { %v429_v53 = vadd.f32 %v428_v52, %v427_v22  ;;  %v436_v56 = vadd.f32 %v435_v25, %v434_v23  ;;  %v1589_v52 = vpop.f32.mrb[4].mxu0 }
 0x3c3   :  { %v1591_v25 = vpop.f32.mrb[5].mxu0 }
 0x3c4   :  { %v437_v26 = vmul.f32 256.0, %v429_v53  ;;  %v438_v27 = vmul.f32 256.0, %v436_v56  ;;  %v1593_v53 = vpop.f32.mrb[6].mxu0  ;;  %v872_v56 = vmax.f32 %v1589_v52, %v1591_v25 }
 0x3c6   :  { %1183 = vrcp.f32 %v437_v26  ;;  %v1597_v26 = vpop.f32.mrb[7].mxu0 }
 0x3c7   :  { %1185 = vrcp.f32 %v438_v27  ;;  %v875_v27 = vmax.f32 %v1593_v53, %v1597_v26 }
 0x3d0   :  { %v1184_v57 = vpop.eup %1183 }
 0x3d1   :  { %v1186_v30 = vpop.eup %1185  ;;  %v443_v8 = vmul.f32 %v1184_v57, %v421_v45  ;;  %v441_v28 = vmul.f32 %v1184_v57, %v419_v15 }
 0x3d2   :  { %v444_v60 = vmul.f32 %v1186_v30, %v422_v21  ;;  %v442_v61 = vmul.f32 %v1186_v30, %v420_v18 }
 0x3d4   :  { %v448_v34 = vadd.f32 %v444_v60, %v443_v8  ;;  %v445_v35 = vadd.f32 %v442_v61, %v441_v28 }
 0x3d6   :  { %449 = vadd.xlane.f32.xlu1 %v448_v34  ;;  %446 = vadd.xlane.f32.xlu0 %v445_v35 }
 0x3da   :  { %680 = vmax.xlane.f32.xlu1 %v679_v29  ;;  %677 = vmax.xlane.f32.xlu0 %v676_v9 }
 0x463   :  { %v450_v3 = vpop.xlane.xlu1 %449  ;;  %v447_v39 = vpop.xlane.xlu0 %446 }
 0x464   :  { %v452_v42 = vmul.f32 16.0, %v450_v3  ;;  %v451_v32 = vmul.f32 16.0, %v447_v39 }
 0x466   :  { %1187 = vrcp.f32 %v452_v42 }
 0x467   :  { %1189 = vrcp.f32 %v451_v32  ;;  %v681_v20 = vpop.xlane.xlu1 %680  ;;  %v678_v14 = vpop.xlane.xlu0 %677 }
 0x468   :  { %vm685_vm2 = vcmp.eq.f32.partialorder %v1567_v63, %v681_v20  ;;  %vm684_vm3 = vcmp.eq.f32.partialorder %v1565_v59, %v678_v14 }
 0x469   :  { %v687_v15 = vsel %vm685_vm2, %v1575_v44, 8  ;;  %v686_v18 = vsel %vm684_vm3, %v1575_v44, 8 }
 0x46a   :  { %v1582_v0 = vsel %vm675_vm1, %v687_v15, 2147483647  ;;  %v1585_v1 = vsel %vm675_vm1, %v686_v18, 2147483647 }
 0x46b   :  { %v705_v59 = vshra.s32 %v1582_v0, 16  ;;  %v690_v49 = vshra.s32 %v1585_v1, 16 }
 0x46d   :  { %v707_v22 = vcvt.s32.f32 %v705_v59  ;;  %v692_v23 = vcvt.s32.f32 %v690_v49 }
 0x470   :  { %v1188_v43 = vpop.eup %1187 }
 0x471   :  { %v1190_v12 = vpop.eup %1189  ;;  %v457_v46 = vmul.f32 %v1188_v43, %v443_v8  ;;  %v458_v33 = vmul.f32 %v1188_v43, %v444_v60 }
 0x472   :  { %v455_v47 = vmul.f32 %v1190_v12, %v441_v28  ;;  %v456_v50 = vmul.f32 %v1190_v12, %v442_v61 }
 0x474   :  { %v459_v13 = vadd.f32 %v457_v46, %v455_v47  ;;  %v466_v51 = vadd.f32 %v458_v33, %v456_v50 }
 0x476   :  { %v460_v36 = vrot.slane %v459_v13, 4  ;;  %v467_v54 = vrot.slane %v466_v51, 4 }
 0x478   :  { %v461_v55 = vadd.f32 %v460_v36, %v459_v13  ;;  %v468_v4 = vadd.f32 %v467_v54, %v466_v51 }
 0x47a   :  { %v462_v58 = vrot.slane %v461_v55, 2  ;;  %v469_v37 = vrot.slane %v468_v4, 2 }
 0x47c   :  { %v463_v16 = vadd.f32 %v462_v58, %v461_v55  ;;  %v470_v62 = vadd.f32 %v469_v37, %v468_v4 }
 0x47e   :  { %v464_v40 = vrot.slane %v463_v16, 1  ;;  %v471_v17 = vrot.slane %v470_v62, 1 }
 0x480   :  { %v465_v6 = vadd.f32 %v464_v40, %v463_v16  ;;  %v472_v7 = vadd.f32 %v471_v17, %v470_v62 }
 0x482   :  { %v473_v41 = vmul.f32 256.0, %v465_v6  ;;  %v474_v10 = vmul.f32 256.0, %v472_v7  ;;  %v704_v7 = vand.u32 65535, %v1582_v0 }
 0x484   :  { %1191 = vrcp.f32 %v473_v41  ;;  %v689_v41 = vand.u32 65535, %v1585_v1  ;;  %v706_v14 = vcvt.s32.f32 %v704_v7 }
 0x485   :  { %1193 = vrcp.f32 %v474_v10 }
 0x486   :  { %v691_v15 = vcvt.s32.f32 %v689_v41 }
 0x48e   :  { %v1192_v45 = vpop.eup %1191 }
 0x48f   :  { %v1194_v21 = vpop.eup %1193  ;;  %v479_v2 = vmul.f32 %v1192_v45, %v457_v46  ;;  %v477_v5 = vmul.f32 %v1192_v45, %v455_v47 }
 0x490   :  { %v480_v48 = vmul.f32 %v1194_v21, %v458_v33  ;;  %v478_v24 = vmul.f32 %v1194_v21, %v456_v50  ;;  %v1310_v21 = vmov 0  }
 0x491   :  { %1107 = vset.pattern.permute.xlu0 %v1310_v21  ;;  %1108 = vset.pattern.permute.xlu1 %v1310_v21 }
 0x492   :  { %v484_v19 = vadd.f32 %v480_v48, %v479_v2  ;;  %v481_v63 = vadd.f32 %v478_v24, %v477_v5 }
 0x494   :  { %485 = vadd.xlane.f32.xlu1 %v484_v19  ;;  %482 = vadd.xlane.f32.xlu0 %v481_v63 }
 0x498   :  { %708 = vmin.xlane.f32.xlu1 %v707_v22  ;;  %693 = vmin.xlane.f32.xlu0 %v692_v23 }
 0x521   :  { %v486_v57 = vpop.xlane.xlu1 %485  ;;  %v483_v30 = vpop.xlane.xlu0 %482 }
 0x522   :  { %v488_v8 = vmul.f32 16.0, %v486_v57  ;;  %v487_v28 = vmul.f32 16.0, %v483_v30 }
 0x524   :  { %1195 = vrcp.f32 %v488_v8 }
 0x525   :  { %1197 = vrcp.f32 %v487_v28  ;;  %v709_v17 = vpop.xlane.xlu1 %708  ;;  %v694_v6 = vpop.xlane.xlu0 %693 }
 0x526   :  { %vm710_vm4 = vcmp.eq.f32.partialorder %v707_v22, %v709_v17  ;;  %vm695_vm5 = vcmp.eq.f32.partialorder %v692_v23, %v694_v6  ;;  %v700_v19 = vcvt.f32.s32 %v694_v6 }
 0x527   :  { %v711_v18 = vsel %vm710_vm4, %v706_v14, inf  ;;  %v696_v45 = vsel %vm695_vm5, %v691_v15, inf }
 0x528   :  { %v701_v30 = vshll.u32 %v700_v19, 16 }
 0x52e   :  { %v1196_v60 = vpop.eup %1195 }
 0x52f   :  { %v1198_v61 = vpop.eup %1197  ;;  %v493_v34 = vmul.f32 %v1196_v60, %v479_v2  ;;  %v494_v35 = vmul.f32 %v1196_v60, %v480_v48 }
 0x530   :  { %v491_v29 = vmul.f32 %v1198_v61, %v477_v5  ;;  %v492_v9 = vmul.f32 %v1198_v61, %v478_v24 }
 0x532   :  { %v495_v38 = vadd.f32 %v493_v34, %v491_v29  ;;  %v502_v3 = vadd.f32 %v494_v35, %v492_v9 }
 0x534   :  { %v496_v39 = vrot.slane %v495_v38, 4  ;;  %v503_v42 = vrot.slane %v502_v3, 4 }
 0x536   :  { %v497_v32 = vadd.f32 %v496_v39, %v495_v38  ;;  %v504_v43 = vadd.f32 %v503_v42, %v502_v3 }
 0x538   :  { %v498_v12 = vrot.slane %v497_v32, 2  ;;  %v505_v46 = vrot.slane %v504_v43, 2 }
 0x53a   :  { %v499_v33 = vadd.f32 %v498_v12, %v497_v32  ;;  %v506_v47 = vadd.f32 %v505_v46, %v504_v43 }
 0x53c   :  { %v500_v50 = vrot.slane %v499_v33, 1  ;;  %v507_v13 = vrot.slane %v506_v47, 1 }
 0x53e   :  { %v501_v51 = vadd.f32 %v500_v50, %v499_v33  ;;  %v508_v36 = vadd.f32 %v507_v13, %v506_v47 }
 0x540   :  { %v509_v54 = vmul.f32 256.0, %v501_v51  ;;  %v510_v55 = vmul.f32 256.0, %v508_v36 }
 0x542   :  { %1199 = vrcp.f32 %v509_v54  ;;  %v918_v54 = vld [vmem:[%s1649_s0] sm:$0x3] }
 0x543   :  { %1201 = vrcp.f32 %v510_v55  ;;  %v927_v55 = vshrl.u32 %v682_v11, 7 }
 0x54c   :  { %v1200_v4 = vpop.eup %1199 }
 0x54d   :  { %v1202_v58 = vpop.eup %1201  ;;  %v515_v37 = vmul.f32 %v1200_v4, %v493_v34  ;;  %v513_v16 = vmul.f32 %v1200_v4, %v491_v29 }
 0x54e   :  { %v516_v62 = vmul.f32 %v1202_v58, %v494_v35  ;;  %v514_v40 = vmul.f32 %v1202_v58, %v492_v9  ;;  %v928_v58 = vsub.s32 0, %v927_v55 }
 0x550   :  { %v520_v10 = vadd.f32 %v516_v62, %v515_v37  ;;  %v517_v20 = vadd.f32 %v514_v40, %v513_v16 }
 0x552   :  { %521 = vadd.xlane.f32.xlu1 %v520_v10  ;;  %518 = vadd.xlane.f32.xlu0 %v517_v20 }
 0x556   :  { %712 = vmin.xlane.f32.xlu1 %v711_v18  ;;  %697 = vmin.xlane.f32.xlu0 %v696_v45 }
 0x55a   :  { %873 = vmax.xlane.f32.xlu0 %v872_v56  ;;  %876 = vmax.xlane.f32.xlu1 %v875_v27  ;;  %v715_v56 = vcvt.f32.s32 %v709_v17 }
 0x55c   :  { %v716_v29 = vshll.u32 %v715_v56, 16 }
 0x5df   :  { %v522_v0 = vpop.xlane.xlu1 %521  ;;  %v519_v2 = vpop.xlane.xlu0 %518 }
 0x5e0   :  { %v524_v1 = vmul.f32 16.0, %v522_v0  ;;  %v523_v5 = vmul.f32 16.0, %v519_v2 }
 0x5e2   :  { %1203 = vrcp.f32 %v524_v1 }
 0x5e3   :  { %1205 = vrcp.f32 %v523_v5  ;;  %v713_v48 = vpop.xlane.xlu1 %712  ;;  %v698_v24 = vpop.xlane.xlu0 %697 }
 0x5e4   :  { %v699_v49 = vcvt.f32.s32 %v698_v24  ;;  %v714_v34 = vcvt.f32.s32 %v713_v48 }
 0x5e6   :  { %v717_v3 = vadd.s32 %v716_v29, %v714_v34  ;;  %v967_v29 = vcvt.s32.f32 %v918_v54 }
 0x5e7   :  { %v874_v63 = vpop.xlane.xlu0 %873  ;;  %v877_v59 = vpop.xlane.xlu1 %876 }
 0x5e8   :  { %v1604_v22 = vsub.f32 %v1589_v52, %v874_v63  ;;  %v1607_v23 = vsub.f32 %v1591_v25, %v874_v63  ;;  %v1610_v27 = vsub.f32 %v1593_v53, %v877_v59  ;;  %v1613_v57 = vsub.f32 %v1597_v26, %v877_v59 }
 0x5e9   :  { %v702_v25 = vadd.s32 %v701_v30, %v699_v49  ;;  %vm719_vm7 = vcmp.eq.s32.totalorder %v1575_v44, %v717_v3  ;;  %v935_v49 = vsub.s32 1, %v927_v55 }
 0x5ea   :  { %v882_v8 = vmul.f32 1.442695, %v1604_v22  ;;  %v884_v28 = vmul.f32 1.442695, %v1607_v23  ;;  %v886_v60 = vmul.f32 1.442695, %v1610_v27 }
 0x5eb   :  { %v888_v52 = vmul.f32 1.442695, %v1613_v57  ;;  %vm718_vm6 = vcmp.eq.s32.totalorder %v1575_v44, %v702_v25  ;;  %v1002_v47 = vsel %vm719_vm7, 1.0, %v1308_v31 }
 0x5ec   :  { %v1204_v61 = vpop.eup %1203  ;;  %1207 = vpow2.f32 %v882_v8  ;;  %v1001_v43 = vsel %vm718_vm6, 1.0, %v1308_v31 }
 0x5ed   :  { %v1206_v35 = vpop.eup %1205  ;;  %1209 = vpow2.f32 %v884_v28  ;;  %v530_v9 = vmul.f32 %v1204_v61, %v516_v62  ;;  %v529_v38 = vmul.f32 %v1204_v61, %v515_v37 }
 0x5ee   :  { %1211 = vpow2.f32 %v886_v60  ;;  %v528_v53 = vmul.f32 %v1206_v35, %v514_v40  ;;  %v527_v26 = vmul.f32 %v1206_v35, %v513_v16 }
 0x5ef   :  { %1213 = vpow2.f32 %v888_v52  ;;  %v534_v32 = vmul.f32 16.0, %v530_v9  ;;  %v533_v12 = vmul.f32 16.0, %v529_v38 }
 0x5f0   :  { %v532_v39 = vmul.f32 16.0, %v528_v53  ;;  %v531_v42 = vmul.f32 16.0, %v527_v26 }
 0x5f2   :  { %727 = vmatprep.subr.mxu1 %v532_v39 }
 0x5f3   :  { %728 = vmatpush1.msra.mxu1 %v531_v42 }
 0x5f4   :  { %1003 = vmatmul.mubr.msk.f32.vlgmr.msra.gmra.mrb[4].mxu1 %vm675_vm1, %v1001_v43  ;;  %801 = vmatprep.subr.mxu1 %v534_v32 }
 0x5f5   :  { %802 = vmatpush1.msra.mxu1 %v533_v12  ;;  %865 = vmatprep.mubr.f32.mxu1 %v1308_v31 }
 0x5f6   :  { %v1208_v46 = vpop.eup %1207 }
 0x5f7   :  { %v1210_v33 = vpop.eup %1209 }
 0x5f8   :  { %v1212_v50 = vpop.eup %1211  ;;  %1004 = vmatmul.mubr.msk.f32.vlgmr.msra.gmra.mrb[6].mxu1 %vm675_vm1, %v1002_v47  ;;  %v890_v13 = vadd.f32 %v1210_v33, %v1208_v46 }
 0x5f9   :  { %v1214_v51 = vpop.eup %1213 }
 0x5fa   :  { %891 = vadd.xlane.f32.xlu0 %v890_v13  ;;  %v893_v36 = vadd.f32 %v1214_v51, %v1212_v50 }
 0x5fc   :  { %894 = vadd.xlane.f32.xlu1 %v893_v36 }
 0x610   :  { %920 = vperm.xlu0 %1107, %v918_v54  }
 0x687   :  { %v892_v4 = vpop.xlane.xlu0 %891 }
 0x688   :  { %1215 = vlog2.f32 %v892_v4 }
 0x689   :  { %v895_v40 = vpop.xlane.xlu1 %894 }
 0x68a   :  { %1217 = vlog2.f32 %v895_v40 }
 0x68b   :  { %1219 = vrcp.f32 %v967_v29 }
 0x68f   :  { %v921_v37 = vpop.permute.xlu0 %920 }
 0x690   :  { %vm922_vm8 = vcmp.lt.s32.totalorder %v1575_v44, %v921_v37 }
 0x691   :  { %v1005_v16 = vsel %vm922_vm8, 1.0, %v1308_v31 }
 0x692   :  { %v929_v62 = vrot.slane %v1005_v16, %v928_v58  ;;  %v1216_v17 = vpop.eup %1215 }
 0x693   :  { %v897_v6 = vmul.f32 0.6931472, %v1216_v17 }
 0x694   :  { %931 = vbcast.lane.b32.xlu1 %v929_v62, 256  ;;  %v1218_v7 = vpop.eup %1217 }
 0x695   :  { %v899_v10 = vmul.f32 0.6931472, %v1218_v7  ;;  %v900_v20 = vsub.f32 %v1604_v22, %v897_v6  ;;  %v901_v15 = vsub.f32 %v1607_v23, %v897_v6  ;;  %v936_v22 = vrot.slane %v1005_v16, %v935_v49  ;;  %v1220_v53 = vpop.eup %1219 }
 0x697   :  { %v902_v0 = vsub.f32 %v1610_v27, %v899_v10  ;;  %v903_v5 = vsub.f32 %v1613_v57, %v899_v10  ;;  %v954_v57 = vsub.s32 %v1575_v44, %v927_v55 }
 0x6c7   :  { %v793_v41 = vpop.f32.mrb[4].mxu1 }
 0x6c8   :  { %v904_v11 = vsub.f32 0.0, %v793_v41  ;;  %v795_v14 = vpop.f32.mrb[5].mxu1 }
 0x6c9   :  { %v905_v18 = vsub.f32 0.0, %v795_v14 }
 0x6ca   :  { %v908_v45 = vmul.f32 %v904_v11, %v900_v20 }
 0x6cb   :  { %v909_v21 = vmul.f32 %v905_v18, %v901_v15  ;;  %v867_v31 = vpop.f32.mrb[6].mxu1 }
 0x6cc   :  { %v906_v2 = vsub.f32 0.0, %v867_v31  ;;  %v869_v1 = vpop.f32.mrb[7].mxu1 }
 0x6cd   :  { %v907_v48 = vsub.f32 0.0, %v869_v1  ;;  %v912_v24 = vadd.f32 %v909_v21, %v908_v45 }
 0x6ce   :  { %v910_v19 = vmul.f32 %v906_v2, %v902_v0 }
 0x6cf   :  { %v911_v63 = vmul.f32 %v907_v48, %v903_v5  ;;  %913 = vadd.xlane.f32.xlu1 %v912_v24 }
 0x6d1   :  { %v915_v59 = vadd.f32 %v911_v63, %v910_v19 }
 0x6d3   :  { %916 = vadd.xlane.f32.xlu1 %v915_v59 }
 0x6e4   :  { %938 = vbcast.lane.b32.xlu1 %v936_v22, 256 }
 0x706   :  { %v932_v23 = vpop.permute.xlu1 %931 }
 0x75c   :  { %v914_v56 = vpop.xlane.xlu1 %913 }
 0x75d   :  { %v942_v30 = vmul.f32 %v932_v23, %v914_v56 }
 0x75f   :  { %947 = vperm.xlu1 %1108, %v942_v30  }
 0x760   :  { %v917_v8 = vpop.xlane.xlu1 %916 }
 0x764   :  { %v939_v27 = vpop.permute.xlu1 %938 }
 0x765   :  { %v943_v28 = vmul.f32 %v939_v27, %v917_v8 }
 0x767   :  { %950 = vperm.xlu1 %1108, %v943_v28  }
 0x7de   :  { %v948_v60 = vpop.permute.xlu1 %947 }
 0x7df   :  { %v955_v61 = vrot.slane %v948_v60, %v954_v57 }
 0x7e6   :  { %v951_v52 = vpop.permute.xlu1 %950 }
 0x7e7   :  { %v959_v34 = vrot.slane %v951_v52, %v954_v57 }
 0x7e9   :  { %v961_v25 = vsel %vm960_vm9, %v959_v34, %v955_v61 }
 0x7ea   :  { %v964_v35 = vsel %vm963_vm10, %v961_v25, 0.0 }
 0x7eb   :  { %965 = vadd.xlane.f32.xlu1 %v964_v35 }
 0x878   :  { %v966_v26 = vpop.xlane.xlu1 %965 }
 0x879   :  { %v969_v9 = vmul.f32 %v1220_v53, %v966_v26 }
 0x87b   :  { %v971_v38 = vsel %vm970_vm11, %v969_v9, 0.0 }
 0x87c   :  { %972 = vadd.xlane.f32.xlu0 %v971_v38 }
 0x909   :  { %v973_v3 = vpop.xlane.xlu0 %972 }
 0x90a   :  { %v974_v39 = vrot.slane %v973_v3, 4 }
 0x90c   :  { %v975_v42 = vadd.f32 %v974_v39, %v973_v3 }
 0x90e   :  { %v976_v44 = vrot.slane %v975_v42, 2 }
 0x910   :  { %v977_v32 = vadd.f32 %v976_v44, %v975_v42 }
 0x912   :  { %v978_v43 = vrot.slane %v977_v32, 1 }
 0x914   :  { %v979_v12 = vadd.f32 %v978_v43, %v977_v32 }
 0x916   :  { %1096 = vpush %v979_v12 }
 0x947   :  { %s1097_s0 = spop %1096 }
 0x948   :  { %s983_s28 = smul.f32 0.5, %s1097_s0 }
 0x94a   :  { %985 = sst [smem:[#allocation8]] %s983_s28 }
 0x94b   :  { %1296 = shalt.err (!%p1293_p12)
}
 0x94c   :  { %s1311_s10 = smov [#allocation8]  }
 0x94d   :  { %993 = dma.smem_to_hbm %s1311_s10, 16, %s1653_s4, [#allocation4]  }
 0x94e   :  { %1301 = dma.done.wait [#allocation4], 16  }
 0x94f   :  { %1302 = vsyncadd [#allocation4], 4294967280 }
 0x950   :  { %997 = sfence }
 0x951   :  { %998 = vsyncpa [#allocation3], 1 }
 0x952   :  { %999 = vsyncpa [#allocation6], 1 }
 0x953   :  { %1000 = vsyncpa [#allocation4], 1 }

</bundles_post_ra>
